<compile_context>
chip_gen: v6e
topology: v6e:2x2x1
jax: 0.10.0
libtpu: 0.0.40
codegen_flags: <defaults>
</compile_context>

<pallas_src>
import functools

import numpy as np
import jax
import jax.numpy as jnp
from jax import lax
from jax.experimental import pallas as pl
from jax.experimental.pallas import tpu as pltpu


def _attn_readout_kernel(feats_ref, bias_ref, last_ref,
                         wu2_ref, bu2_ref, wvb_ref, wet_ref,
                         out_ref, *, gb, seq):
    """One program handles `gb` graphs; all orders & both branches fused.

    Block shapes:
      feats_ref : [gb, S, D]             zero-padded per-graph node features
      bias_ref  : [gb, 1, S]             0.0 real row / -1e30 padding
      last_ref  : [gb, 1, 2*order*D]     last-node feats (invar orders | var orders)
      wu2_ref   : [D, 2*order*H]         [Wu_0|..|Wu_{o-1}] tiled for both branches
      bu2_ref   : [1, 2*order*H]
      wvb_ref   : [2*order*D, 2*order*H] block-diagonal Wv
      wet_ref   : [2*order, 2*order*H]   row c holds we[c % order] in its H-block
      out_ref   : [gb, 2*order, D]       rows 0..order-1 = invar, order.. = var
    """
    feats = feats_ref[...]                                  # [gb, S, D] (loaded once)
    d = feats.shape[-1]
    wvb = wvb_ref[...]
    wet = wet_ref[...]

    # fc_u for every graph in the block, every order and both branches: ONE matmul.
    # Reshape is tile-aligned (S % 8 == 0) -> layout preserving, no VMEM copy.
    u = jnp.dot(feats.reshape(gb * seq, d), wu2_ref[...],
                preferred_element_type=jnp.float32) + bu2_ref[...]       # [gb*S, 2OH]

    nt = (((1,), (1,)), ((), ()))   # NT matmul: contract last dims of both operands

    # gb is a small static constant -> fully unrolled; only the genuinely per-graph
    # work (fc_v broadcast, softmax, weighted reduction) lives in the loop.
    for g in range(gb):
        # fc_v for all (branch, order) pairs of graph g: one block-diagonal matmul.
        v = jnp.dot(last_ref[g], wvb, preferred_element_type=jnp.float32)  # [1, 2OH]
        sig = jax.nn.sigmoid(u[g * seq:(g + 1) * seq, :] + v)              # [S, 2OH]
        # fc_e: one NT matmul -> e laid out [2*order, S] (nodes along lanes).
        e = lax.dot_general(wet, sig, nt,
                            preferred_element_type=jnp.float32)            # [2O, S]
        e = e + bias_ref[g]                                # padded nodes -> ~-1e30

        # masked segment softmax along the node (lane) axis.
        m = jnp.max(e, axis=-1, keepdims=True)                             # [2O, 1]
        p = jnp.exp(e - m)                                  # padded lanes underflow to 0
        alpha = p / jnp.sum(p, axis=-1, keepdims=True)                     # [2O, S]

        # weighted segment sum on the MXU; padded feats rows are exactly zero.
        out_ref[g] = jnp.dot(alpha, feats[g], preferred_element_type=jnp.float32)


def attn_readout_pallas(feats_pad, bias, last_flat, Wu, bu, Wv, we,
                        *, graphs_per_block=None):
    B, S, D = feats_pad.shape
    order, _, H = Wu.shape
    OH2 = 2 * order * H
    OD2 = 2 * order * D

    if graphs_per_block is None:
        graphs_per_block = next(g for g in (8, 4, 2, 1) if B % g == 0)
    Gb = graphs_per_block
    assert B % Gb == 0, "batch size must be divisible by graphs_per_block"
    assert S % 8 == 0, "S must be padded to a multiple of 8 (sublane tiling)"

    # ---- parameter repacking (layout plumbing only; done host/XLA side) ----
    Wu_cat = jnp.concatenate([Wu[i] for i in range(order)], axis=1)      # [D, order*H]
    wu2 = jnp.concatenate([Wu_cat, Wu_cat], axis=1)                      # [D, 2*order*H]
    bu_cat = jnp.concatenate([bu[i] for i in range(order)], axis=1)      # [1, order*H]
    bu2 = jnp.concatenate([bu_cat, bu_cat], axis=1)                      # [1, 2*order*H]
    wvb_np = np.zeros((OD2, OH2), np.float32)
    wet_np = np.zeros((2 * order, OH2), np.float32)
    for r in range(2 * order):
        i = r % order
        wvb_np[r * D:(r + 1) * D, r * H:(r + 1) * H] = np.asarray(Wv[i])
        wet_np[r, r * H:(r + 1) * H] = np.asarray(we[i, :, 0])
    wvb = jnp.asarray(wvb_np)
    wet = jnp.asarray(wet_np)

    kernel = functools.partial(_attn_readout_kernel, gb=Gb, seq=S)
    out = pl.pallas_call(
        kernel,
        out_shape=jax.ShapeDtypeStruct((B, 2 * order, D), jnp.float32),
        grid_spec=pltpu.PrefetchScalarGridSpec(
            num_scalar_prefetch=0,
            grid=(B // Gb,),
            in_specs=[
                pl.BlockSpec((Gb, S, D), lambda n: (n, 0, 0)),        # feats_pad
                pl.BlockSpec((Gb, 1, S), lambda n: (n, 0, 0)),        # additive mask bias
                pl.BlockSpec((Gb, 1, OD2), lambda n: (n, 0, 0)),      # last-node feats
                pl.BlockSpec((D, OH2), lambda n: (0, 0)),             # wu2 (resident)
                pl.BlockSpec((1, OH2), lambda n: (0, 0)),             # bu2 (resident)
                pl.BlockSpec((OD2, OH2), lambda n: (0, 0)),           # wvb (resident)
                pl.BlockSpec((2 * order, OH2), lambda n: (0, 0)),     # wet (resident)
            ],
            out_specs=pl.BlockSpec((Gb, 2 * order, D), lambda n: (n, 0, 0)),
        ),
        compiler_params=pltpu.CompilerParams(
            dimension_semantics=("parallel",)),   # shards graphs across TCs on v7x
    )(feats_pad, bias, last_flat, wu2, bu2, wvb, wet)

    return out[:, :order, :], out[:, order:, :]


# ---------------------------------------------------------------------------
# Glue: build the padded per-graph slab from the ragged graph inputs (host side)
# ---------------------------------------------------------------------------
def build_padded_inputs(feats_invar_list, feats_var_list, counts, last_nodess):
    order = len(counts)
    B = len(counts[0])
    D = feats_invar_list[0].shape[1]
    seg_sizes = [2 * sum(int(counts[i][b]) for i in range(order)) for b in range(B)]
    S = max(seg_sizes)
    S = ((S + 7) // 8) * 8                      # pad sublane dim to a multiple of 8
    feats_pad = np.zeros((B, S, D), np.float32)          # padded rows MUST stay zero
    bias = np.full((B, 1, S), -1e30, np.float32)         # additive softmax mask
    offs = [np.concatenate([[0], np.cumsum(counts[i])]) for i in range(order)]
    for b in range(B):
        rows = []
        for i in range(order):   # invariant features of all orders for this graph
            rows.append(np.asarray(feats_invar_list[i])[offs[i][b]:offs[i][b + 1]])
        for i in range(order):   # variant features of all orders for this graph
            rows.append(np.asarray(feats_var_list[i])[offs[i][b]:offs[i][b + 1]])
        rows = np.concatenate(rows, axis=0)
        n = rows.shape[0]
        feats_pad[b, :n] = rows
        bias[b, 0, :n] = 0.0
    # last-node features flattened branch-major: [invar o0..oK-1 | var o0..oK-1]
    last_blocks = []
    for branch in (feats_invar_list, feats_var_list):
        for i in range(order):
            last_blocks.append(np.asarray(branch[i])[np.asarray(last_nodess[i])])  # [B, D]
    last_flat = np.concatenate(last_blocks, axis=1)[:, None, :]   # [B, 1, 2*order*D]
    return jnp.asarray(feats_pad), jnp.asarray(bias), jnp.asarray(last_flat)


# ---------------------------------------------------------------------------
# Pure-JAX reference that follows the PyTorch forward structure (ragged loops)
# ---------------------------------------------------------------------------
def reference_attn_readout(feats_invar_list, feats_var_list, counts, last_nodess,
                           Wu, bu, Wv, we):
    order = len(counts)
    B = len(counts[0])

    def split(arr, cnts):
        out, off = [], 0
        for c in cnts:
            out.append(arr[off:off + int(c)])
            off += int(c)
        return out

    nfeats_invar = [split(feats_invar_list[i], counts[i]) for i in range(order)]
    nfeats_var = [split(feats_var_list[i], counts[i]) for i in range(order)]
    feat_vs_invar = jnp.stack(
        [feats_invar_list[i][last_nodess[i]] for i in range(order)], axis=1)  # [B, order, D]
    feat_vs_var = jnp.stack(
        [feats_var_list[i][last_nodess[i]] for i in range(order)], axis=1)

    graph_feats = []
    for b in range(B):
        rows = [nfeats_invar[j][b] for j in range(order)] + \
               [nfeats_var[j][b] for j in range(order)]
        graph_feats.append(jnp.concatenate(rows, axis=0))

    rsts_invar, rsts_var = [], []
    for i in range(order):
        ri, rv = [], []
        for b in range(B):
            fb = graph_feats[b]
            u = fb @ Wu[i] + bu[i, 0]
            v_inv = feat_vs_invar[b, i] @ Wv[i]
            v_var = feat_vs_var[b, i] @ Wv[i]
            e_inv = jax.nn.sigmoid(u + v_inv) @ we[i, :, 0]
            e_var = jax.nn.sigmoid(u + v_var) @ we[i, :, 0]
            a_inv = jax.nn.softmax(e_inv)
            a_var = jax.nn.softmax(e_var)
            ri.append(jnp.sum(fb * a_inv[:, None], axis=0))
            rv.append(jnp.sum(fb * a_var[:, None], axis=0))
        rsts_invar.append(jnp.stack(ri))
        rsts_var.append(jnp.stack(rv))
    return jnp.stack(rsts_invar, axis=1), jnp.stack(rsts_var, axis=1)


if __name__ == "__main__":
    B, ORDER, D, H = 4, 2, 32, 32

    # per-order, per-graph node counts (ragged graph structure)
    counts = [np.array([5, 3, 6, 2], np.int32),   # s1
              np.array([4, 2, 3, 5], np.int32)]   # s2
    tot = [int(counts[i].sum()) for i in range(ORDER)]
    # last node index (into the concatenated per-order node array) for each graph
    last_nodess = [np.cumsum(counts[i]).astype(np.int32) - 1 for i in range(ORDER)]

    key = jax.random.PRNGKey(0)
    keys = jax.random.split(key, 2 * ORDER + 1)
    feats_invar_list = [jax.random.normal(keys[i], (tot[i], D), jnp.float32)
                        for i in range(ORDER)]
    feats_var_list = [jax.random.normal(keys[ORDER + i], (tot[i], D), jnp.float32)
                      for i in range(ORDER)]

    # deterministic parameter init (nn.Linear-style uniform(-1/sqrt(fan_in), +))
    def linear_w(k, fan_in, fan_out):
        bound = 1.0 / np.sqrt(fan_in)
        return jax.random.uniform(k, (fan_in, fan_out), jnp.float32, -bound, bound)

    wk = jax.random.split(keys[-1], 4 * ORDER)
    Wu = jnp.stack([linear_w(wk[4 * i + 0], D, H) for i in range(ORDER)])   # [order, D, H]
    bu = jnp.stack([linear_w(wk[4 * i + 1], 1, H) for i in range(ORDER)])   # [order, 1, H]
    Wv = jnp.stack([linear_w(wk[4 * i + 2], D, H) for i in range(ORDER)])   # [order, D, H]
    we = jnp.stack([linear_w(wk[4 * i + 3], H, 1) for i in range(ORDER)])   # [order, H, 1]
    # TODO(synk): fc_out / activation are applied after rst is appended in the PyTorch
    # forward and therefore never affect the returned tensors; feat_drop is never called.

    feats_pad, bias, last_flat = build_padded_inputs(
        feats_invar_list, feats_var_list, counts, last_nodess)

    rst_inv, rst_var = attn_readout_pallas(
        feats_pad, bias, last_flat, Wu, bu, Wv, we, graphs_per_block=2)
    jax.block_until_ready((rst_inv, rst_var))

    ref_inv, ref_var = reference_attn_readout(
        feats_invar_list, feats_var_list, counts, last_nodess, Wu, bu, Wv, we)

    np.testing.assert_allclose(np.asarray(rst_inv), np.asarray(ref_inv),
                               rtol=1e-4, atol=1e-4)
    np.testing.assert_allclose(np.asarray(rst_var), np.asarray(ref_var),
                               rtol=1e-4, atol=1e-4)
    print("KERNEL_OK")
</pallas_src>

<mosaic_0001>
module attributes {stable_mosaic.version = 11 : i64} {
  func.func @_attn_readout_kernel(%arg0: i32, %arg1: memref<2x24x32xf32, #tpu.memory_space<vmem>>, %arg2: memref<2x1x24xf32, #tpu.memory_space<vmem>>, %arg3: memref<2x1x128xf32, #tpu.memory_space<vmem>>, %arg4: memref<32x128xf32, #tpu.memory_space<vmem>>, %arg5: memref<1x128xf32, #tpu.memory_space<vmem>>, %arg6: memref<128x128xf32, #tpu.memory_space<vmem>>, %arg7: memref<4x128xf32, #tpu.memory_space<vmem>>, %arg8: memref<2x4x32xf32, #tpu.memory_space<vmem>>) attributes {dimension_semantics = [#tpu.dimension_semantics<parallel>], iteration_bounds = array<i64: 2>, scalar_prefetch = 0 : i64, scratch_operands = 0 : i64, tpu.core_type = #tpu.core_type<tc>, window_params = [{transform_indices = @transform_0, window_bounds = array<i64: 2, 24, 32>}, {transform_indices = @transform_1, window_bounds = array<i64: 2, 1, 24>}, {transform_indices = @transform_2, window_bounds = array<i64: 2, 1, 128>}, {pipeline_mode = #tpu.pipeline_mode<synchronous>, transform_indices = @transform_3, window_bounds = array<i64: 32, 128>}, {pipeline_mode = #tpu.pipeline_mode<synchronous>, transform_indices = @transform_4, window_bounds = array<i64: 1, 128>}, {pipeline_mode = #tpu.pipeline_mode<synchronous>, transform_indices = @transform_5, window_bounds = array<i64: 128, 128>}, {pipeline_mode = #tpu.pipeline_mode<synchronous>, transform_indices = @transform_6, window_bounds = array<i64: 4, 128>}, {transform_indices = @transform_7, window_bounds = array<i64: 2, 4, 32>}]} {
    %c0 = arith.constant 0 : index
    %c0_0 = arith.constant 0 : index
    %c0_1 = arith.constant 0 : index
    %0 = vector.load %arg1[%c0, %c0_0, %c0_1] : memref<2x24x32xf32, #tpu.memory_space<vmem>>, vector<2x24x32xf32>
    %c0_2 = arith.constant 0 : index
    %c0_3 = arith.constant 0 : index
    %1 = vector.load %arg6[%c0_2, %c0_3] : memref<128x128xf32, #tpu.memory_space<vmem>>, vector<128x128xf32>
    %c0_4 = arith.constant 0 : index
    %c0_5 = arith.constant 0 : index
    %2 = vector.load %arg7[%c0_4, %c0_5] : memref<4x128xf32, #tpu.memory_space<vmem>>, vector<4x128xf32>
    %3 = vector.shape_cast %0 : vector<2x24x32xf32> to vector<48x32xf32>
    %c0_6 = arith.constant 0 : index
    %c0_7 = arith.constant 0 : index
    %4 = vector.load %arg4[%c0_6, %c0_7] : memref<32x128xf32, #tpu.memory_space<vmem>>, vector<32x128xf32>
    %cst = arith.constant dense<0.000000e+00> : vector<48x128xf32>
    %5 = tpu.matmul %3, %4, %cst {dimension_numbers = #tpu.dot_dimension_numbers<[1], [0], [0], [1], [0, 0, 1, 1], [], []>} : vector<48x32xf32>, vector<32x128xf32>, vector<48x128xf32> -> vector<48x128xf32>
    %c0_8 = arith.constant 0 : index
    %c0_9 = arith.constant 0 : index
    %6 = vector.load %arg5[%c0_8, %c0_9] : memref<1x128xf32, #tpu.memory_space<vmem>>, vector<1x128xf32>
    %7 = vector.broadcast %6 : vector<1x128xf32> to vector<48x128xf32>
    %8 = arith.addf %5, %7 : vector<48x128xf32>
    %c0_10 = arith.constant 0 : index
    %c0_11 = arith.constant 0 : index
    %c0_12 = arith.constant 0 : index
    %9 = vector.load %arg3[%c0_10, %c0_11, %c0_12] : memref<2x1x128xf32, #tpu.memory_space<vmem>>, vector<1x1x128xf32>
    %10 = vector.shape_cast %9 : vector<1x1x128xf32> to vector<1x128xf32>
    %cst_13 = arith.constant dense<0.000000e+00> : vector<1x128xf32>
    %11 = tpu.matmul %10, %1, %cst_13 {dimension_numbers = #tpu.dot_dimension_numbers<[1], [0], [0], [1], [0, 0, 1, 1], [], []>} : vector<1x128xf32>, vector<128x128xf32>, vector<1x128xf32> -> vector<1x128xf32>
    %12 = vector.extract_strided_slice %8 {offsets = [0, 0], sizes = [24, 128], strides = [1, 1]} : vector<48x128xf32> to vector<24x128xf32>
    %13 = vector.broadcast %11 : vector<1x128xf32> to vector<24x128xf32>
    %14 = arith.addf %12, %13 : vector<24x128xf32>
    %15 = arith.negf %14 : vector<24x128xf32>
    %16 = math.exp %15 : vector<24x128xf32>
    %cst_14 = arith.constant 1.000000e+00 : f32
    %17 = vector.broadcast %cst_14 : f32 to vector<24x128xf32>
    %18 = arith.addf %17, %16 : vector<24x128xf32>
    %19 = arith.divf %17, %18 : vector<24x128xf32>
    %cst_15 = arith.constant dense<0.000000e+00> : vector<4x24xf32>
    %20 = tpu.matmul %2, %19, %cst_15 {dimension_numbers = #tpu.dot_dimension_numbers<[1], [1], [0], [0], [0, 0, 1, 0], [], []>} : vector<4x128xf32>, vector<24x128xf32>, vector<4x24xf32> -> vector<4x24xf32>
    %c0_16 = arith.constant 0 : index
    %c0_17 = arith.constant 0 : index
    %c0_18 = arith.constant 0 : index
    %21 = vector.load %arg2[%c0_16, %c0_17, %c0_18] : memref<2x1x24xf32, #tpu.memory_space<vmem>>, vector<1x1x24xf32>
    %22 = vector.shape_cast %21 : vector<1x1x24xf32> to vector<1x24xf32>
    %23 = vector.broadcast %22 : vector<1x24xf32> to vector<4x24xf32>
    %24 = arith.addf %20, %23 : vector<4x24xf32>
    %cst_19 = arith.constant dense<0xFF800000> : vector<4xf32>
    %25 = vector.multi_reduction <maximumf>, %24, %cst_19 [1] : vector<4x24xf32> to vector<4xf32>
    %26 = vector.shape_cast %25 : vector<4xf32> to vector<4x1xf32>
    %27 = vector.broadcast %26 : vector<4x1xf32> to vector<4x24xf32>
    %28 = arith.subf %24, %27 : vector<4x24xf32>
    %29 = math.exp %28 : vector<4x24xf32>
    %cst_20 = arith.constant dense<0.000000e+00> : vector<4xf32>
    %30 = vector.multi_reduction <add>, %29, %cst_20 [1] : vector<4x24xf32> to vector<4xf32>
    %31 = vector.shape_cast %30 : vector<4xf32> to vector<4x1xf32>
    %32 = vector.broadcast %31 : vector<4x1xf32> to vector<4x24xf32>
    %33 = arith.divf %29, %32 : vector<4x24xf32>
    %34 = vector.extract_strided_slice %0 {offsets = [0, 0, 0], sizes = [1, 24, 32], strides = [1, 1, 1]} : vector<2x24x32xf32> to vector<1x24x32xf32>
    %35 = vector.shape_cast %34 : vector<1x24x32xf32> to vector<24x32xf32>
    %cst_21 = arith.constant dense<0.000000e+00> : vector<4x32xf32>
    %36 = tpu.matmul %33, %35, %cst_21 {dimension_numbers = #tpu.dot_dimension_numbers<[1], [0], [0], [1], [0, 0, 1, 1], [], []>} : vector<4x24xf32>, vector<24x32xf32>, vector<4x32xf32> -> vector<4x32xf32>
    %c0_22 = arith.constant 0 : index
    %c0_23 = arith.constant 0 : index
    %c0_24 = arith.constant 0 : index
    %37 = vector.load %arg8[%c0_22, %c0_23, %c0_24] : memref<2x4x32xf32, #tpu.memory_space<vmem>>, vector<1x4x32xf32>
    %38 = vector.shape_cast %37 : vector<1x4x32xf32> to vector<4x32xf32>
    %39 = vector.shape_cast %36 : vector<4x32xf32> to vector<1x4x32xf32>
    tpu.vector_store %arg8[%c0_22, %c0_23, %c0_24], %39 {strides = array<i32>} : memref<2x4x32xf32, #tpu.memory_space<vmem>>, vector<1x4x32xf32>,
    %c1 = arith.constant 1 : index
    %c0_25 = arith.constant 0 : index
    %c0_26 = arith.constant 0 : index
    %40 = vector.load %arg3[%c1, %c0_25, %c0_26] : memref<2x1x128xf32, #tpu.memory_space<vmem>>, vector<1x1x128xf32>
    %41 = vector.shape_cast %40 : vector<1x1x128xf32> to vector<1x128xf32>
    %cst_27 = arith.constant dense<0.000000e+00> : vector<1x128xf32>
    %42 = tpu.matmul %41, %1, %cst_27 {dimension_numbers = #tpu.dot_dimension_numbers<[1], [0], [0], [1], [0, 0, 1, 1], [], []>} : vector<1x128xf32>, vector<128x128xf32>, vector<1x128xf32> -> vector<1x128xf32>
    %43 = vector.extract_strided_slice %8 {offsets = [24, 0], sizes = [24, 128], strides = [1, 1]} : vector<48x128xf32> to vector<24x128xf32>
    %44 = vector.broadcast %42 : vector<1x128xf32> to vector<24x128xf32>
    %45 = arith.addf %43, %44 : vector<24x128xf32>
    %46 = arith.negf %45 : vector<24x128xf32>
    %47 = math.exp %46 : vector<24x128xf32>
    %cst_28 = arith.constant 1.000000e+00 : f32
    %48 = vector.broadcast %cst_28 : f32 to vector<24x128xf32>
    %49 = arith.addf %48, %47 : vector<24x128xf32>
    %50 = arith.divf %48, %49 : vector<24x128xf32>
    %cst_29 = arith.constant dense<0.000000e+00> : vector<4x24xf32>
    %51 = tpu.matmul %2, %50, %cst_29 {dimension_numbers = #tpu.dot_dimension_numbers<[1], [1], [0], [0], [0, 0, 1, 0], [], []>} : vector<4x128xf32>, vector<24x128xf32>, vector<4x24xf32> -> vector<4x24xf32>
    %c1_30 = arith.constant 1 : index
    %c0_31 = arith.constant 0 : index
    %c0_32 = arith.constant 0 : index
    %52 = vector.load %arg2[%c1_30, %c0_31, %c0_32] : memref<2x1x24xf32, #tpu.memory_space<vmem>>, vector<1x1x24xf32>
    %53 = vector.shape_cast %52 : vector<1x1x24xf32> to vector<1x24xf32>
    %54 = vector.broadcast %53 : vector<1x24xf32> to vector<4x24xf32>
    %55 = arith.addf %51, %54 : vector<4x24xf32>
    %cst_33 = arith.constant dense<0xFF800000> : vector<4xf32>
    %56 = vector.multi_reduction <maximumf>, %55, %cst_33 [1] : vector<4x24xf32> to vector<4xf32>
    %57 = vector.shape_cast %56 : vector<4xf32> to vector<4x1xf32>
    %58 = vector.broadcast %57 : vector<4x1xf32> to vector<4x24xf32>
    %59 = arith.subf %55, %58 : vector<4x24xf32>
    %60 = math.exp %59 : vector<4x24xf32>
    %cst_34 = arith.constant dense<0.000000e+00> : vector<4xf32>
    %61 = vector.multi_reduction <add>, %60, %cst_34 [1] : vector<4x24xf32> to vector<4xf32>
    %62 = vector.shape_cast %61 : vector<4xf32> to vector<4x1xf32>
    %63 = vector.broadcast %62 : vector<4x1xf32> to vector<4x24xf32>
    %64 = arith.divf %60, %63 : vector<4x24xf32>
    %65 = vector.extract_strided_slice %0 {offsets = [1, 0, 0], sizes = [1, 24, 32], strides = [1, 1, 1]} : vector<2x24x32xf32> to vector<1x24x32xf32>
    %66 = vector.shape_cast %65 : vector<1x24x32xf32> to vector<24x32xf32>
    %cst_35 = arith.constant dense<0.000000e+00> : vector<4x32xf32>
    %67 = tpu.matmul %64, %66, %cst_35 {dimension_numbers = #tpu.dot_dimension_numbers<[1], [0], [0], [1], [0, 0, 1, 1], [], []>} : vector<4x24xf32>, vector<24x32xf32>, vector<4x32xf32> -> vector<4x32xf32>
    %c1_36 = arith.constant 1 : index
    %c0_37 = arith.constant 0 : index
    %c0_38 = arith.constant 0 : index
    %68 = vector.load %arg8[%c1_36, %c0_37, %c0_38] : memref<2x4x32xf32, #tpu.memory_space<vmem>>, vector<1x4x32xf32>
    %69 = vector.shape_cast %68 : vector<1x4x32xf32> to vector<4x32xf32>
    %70 = vector.shape_cast %67 : vector<4x32xf32> to vector<1x4x32xf32>
    tpu.vector_store %arg8[%c1_36, %c0_37, %c0_38], %70 {strides = array<i32>} : memref<2x4x32xf32, #tpu.memory_space<vmem>>, vector<1x4x32xf32>,
    return
  }
  func.func @transform_0(%arg0: i32) -> (i32, i32, i32) {
    %c0_i32 = arith.constant 0 : i32
    %c0_i32_0 = arith.constant 0 : i32
    %c0_i32_1 = arith.constant 0 : i32
    return %arg0, %c0_i32, %c0_i32_0 : i32, i32, i32
  }
  func.func @transform_1(%arg0: i32) -> (i32, i32, i32) {
    %c0_i32 = arith.constant 0 : i32
    %c0_i32_0 = arith.constant 0 : i32
    %c0_i32_1 = arith.constant 0 : i32
    return %arg0, %c0_i32, %c0_i32_0 : i32, i32, i32
  }
  func.func @transform_2(%arg0: i32) -> (i32, i32, i32) {
    %c0_i32 = arith.constant 0 : i32
    %c0_i32_0 = arith.constant 0 : i32
    %c0_i32_1 = arith.constant 0 : i32
    return %arg0, %c0_i32, %c0_i32_0 : i32, i32, i32
  }
  func.func @transform_3(%arg0: i32) -> (i32, i32) {
    %c0_i32 = arith.constant 0 : i32
    %c0_i32_0 = arith.constant 0 : i32
    %c0_i32_1 = arith.constant 0 : i32
    return %c0_i32, %c0_i32_0 : i32, i32
  }
  func.func @transform_4(%arg0: i32) -> (i32, i32) {
    %c0_i32 = arith.constant 0 : i32
    %c0_i32_0 = arith.constant 0 : i32
    %c0_i32_1 = arith.constant 0 : i32
    return %c0_i32, %c0_i32_0 : i32, i32
  }
  func.func @transform_5(%arg0: i32) -> (i32, i32) {
    %c0_i32 = arith.constant 0 : i32
    %c0_i32_0 = arith.constant 0 : i32
    %c0_i32_1 = arith.constant 0 : i32
    return %c0_i32, %c0_i32_0 : i32, i32
  }
  func.func @transform_6(%arg0: i32) -> (i32, i32) {
    %c0_i32 = arith.constant 0 : i32
    %c0_i32_0 = arith.constant 0 : i32
    %c0_i32_1 = arith.constant 0 : i32
    return %c0_i32, %c0_i32_0 : i32, i32
  }
  func.func @transform_7(%arg0: i32) -> (i32, i32, i32) {
    %c0_i32 = arith.constant 0 : i32
    %c0_i32_0 = arith.constant 0 : i32
    %c0_i32_1 = arith.constant 0 : i32
    return %arg0, %c0_i32, %c0_i32_0 : i32, i32, i32
  }
}

</mosaic_0001>

<bundles_post_ra>
// kernel: tpu_custom_call.1
= control target key start
LH: loop header
LB: loop body
LE: loop exit
PB: predicated region body
PF: predicated region fallthrough
CT: control target
= control target key end

     0   :  { %s2326_s0 = inlined_call_operand.hbm [shape: f32[4,24,32], index: 0, kind: input, shape index: {}]   ;;  %s2327_s1 = inlined_call_operand.hbm [shape: f32[4,1,24], index: 1, kind: input, shape index: {}]   ;;  %s2328_s2 = inlined_call_operand.hbm [shape: f32[4,1,128], index: 2, kind: input, shape index: {}]   ;;  %s2329_s3 = inlined_call_operand.hbm [shape: f32[32,128], index: 3, kind: input, shape index: {}]   ;;  %s2330_s4 = inlined_call_operand.vmem [shape: f32[1,128], index: 4, kind: input, shape index: {}]   ;;  %s2331_s5 = inlined_call_operand.hbm [shape: f32[128,128], index: 5, kind: input, shape index: {}]   ;;  %s2332_s6 = inlined_call_operand.vmem [shape: f32[4,128], index: 6, kind: input, shape index: {}]   ;;  %s2333_s7 = inlined_call_operand.hbm [shape: f32[4,4,32], index: 7, kind: output, shape index: {}]  }
   0x1   :  { %2355 = sst [smem:[#allocation21_spill]] %s2327_s1 }
   0x2   :  { %2356 = sst [smem:[#allocation22_spill]] %s2329_s3 }
   0x3   :  { %2357 = sst [smem:[#allocation23_spill]] %s2333_s7 }
   0x4   :  { %12 = vsyncpa [#allocation3], 0 }
   0x5   :  { %14 = vsyncpa [#allocation3 + $0x1], 0 }
   0x6   :  { %15 = vsyncpa [#allocation6], 0 }
   0x7   :  { %17 = vsyncpa [#allocation6 + $0x1], 0 }
   0x8   :  { %18 = vsyncpa [#allocation9], 0 }
   0x9   :  { %19 = vsyncpa [#allocation4], 0 }
   0xa   :  { %21 = vsyncpa [#allocation4 + $0x1], 0  ;;  %s1842_s24 = smov 0   ;;  %s1844_s25 = smov 0  }
   0xb   :  { %s1846_s26 = smov 0   ;;  %s1848_s27 = smov 0  }
   0xc LB: > { %2358 = sst [smem:[#allocation16_spill]] %s1774_s24  ;;  %s1863_s28 = sadd.s32 4294967295, %s1786_s27   ;;  %s1786_s27 = sphi %s1848_s27, %s2391_s27   ;;  %s1782_s26 = sphi %s1846_s26, %s2393_s26   ;;  %s1778_s25 = sphi %s1844_s25, %s2395_s25   ;;  %s1774_s24 = sphi %s1842_s24, %s2394_s24  }
   0xd   : > { %2359 = sst [smem:[#allocation17_spill]] %s1782_s26  ;;  %s1227_s29 = sadd.s32 4294967294, %s1786_s27  }
   0xe   : > { %s1867_s30 = sadd.s32 1, %s1786_s27   ;;  %s34_s8 = sadd.s32 1, %s1782_s26 }
   0xf   : > { %2360 = sst [smem:[#allocation18_spill]] %s1867_s30  ;;  %s31_s9 = ssub.s32 %s1786_s27, %s1867_s30 }
  0x10   : > { %p41_p0 = scmp.ne.s32.totalorder %s1782_s26, %s1778_s25  ;;  %p32_p1 = scmp.eq.s32.totalorder %s31_s9, 0 }
  0x11   : > { %p42_p2 = scmp.eq.s32.totalorder %s1786_s27, 0  ;;  %p47_p3 = scmp.ne.s32.totalorder %s1778_s25, %s1774_s24 }
  0x12   : > { %p2334_p4 = scmp.eq.s32.totalorder %s1863_s28, 0  ;;  %p207_p7 = scmp.eq.s32.totalorder %s1863_s28, 1 }
  0x13   : > { %s1879_s10 = scalar_select %p32_p1, %s1782_s26, %s34_s8  }
  0x14   : > { %p1881_p5 = por %p42_p2, %p41_p0  ;;  %p1887_p6 = por %p2334_p4, %p47_p3 }
  0x15   : > { %2361 = sst [smem:[#allocation19_spill]] %s1879_s10  ;;  %p213_p8 = scmp.eq.s32.totalorder %s1227_s29, 1 }
  0x16   : > { %s2363_s12 = scalar_select %p1887_p6, 1, 0 }
  0x17   : > { %p1228_p9 = scmp.ge.s32.totalorder %s1786_s27, 1  ;;  %p220_p10 = scmp.lt.s32.totalorder %s1786_s27, 3 }
  0x18   : > { %p1894_p11 = por %p207_p7, %p41_p0  ;;  %p1898_p12 = por %p213_p8, %p47_p3 }
  0x19   : > { %p1902_p13 = pnand %p1228_p9, %p220_p10  ;;  %s1788_s16 = smov [#allocation8]  }
  0x1a   : > { %s2364_s13 = scalar_select %p1894_p11, 1, 0 }
  0x1b   : > { %s2365_s14 = scalar_select %p1898_p12, 1, 0 }
  0x1c   : > { %s2367_s15 = scalar_select %p1902_p13, 1, 0 }
  0x1d   : > { %2366 = sst [smem:[#allocation20_spill]] %s2365_s14  ;;  %p1477_p1 = pneg %p1902_p13 }
  0x1e   : > { %s232_s17 = sshll.u32 %s1788_s16, 4  ;;  %p1500_p3 = scmp.lt.s32.totalorder %s1786_s27, 2  ;;  %s233_s17 = int_to_ptr.vmem [resolvable:$true] %s232_s17 }
  0x1f   : > { %p1910_p2 = pnand %p1477_p1, %p2334_p4  ;;  %s1917_s19 = sand.u32 1, %s1782_s26  }
  0x20   : > { %s287_s20 = sand.u32 1, %s1786_s27   ;;  %s1589_s21 = scalar_lea.vmem %s233_s17, 512 }
  0x21   : > { %s2368_s18 = scalar_select %p1910_p2, 1, 0 }
  0x22   : > { %p2345_p7 = pneg %p1910_p2  ;;  %p1590_p8 = scmp.ne.s32.totalorder %s233_s17, %s1589_s21 }
  0x23   : > { %p1597_p12 = scmp.lt.s32.totalorder %s233_s17, %s233_s17  ;;  %p1598_p1 = scmp.lt.s32.totalorder %s1589_s21, %s1589_s21 }
  0x24   : > { %p1592_p9 = pnand %p1590_p8, %p2345_p7 }
  0x25   : > { %p1599_p4 = por %p1598_p1, %p1597_p12 }
  0x26   : > { %p1593_p10 = pneg %p1592_p9 }
  0x28   : > { %p1600_p11 = pnand %p1599_p4, %p1593_p10 }
  0x2a   : > { %1603 = shalt.err (!%p1600_p11)
}
  0x2b   : > { %s2339_s22 = smov 128   ;;  %s2341_s23 = smov 8  }
  0x2c   : > { %s2369_s3 = sld [smem:[#allocation22_spill]]  ;;  %p1937_p4 = pnand %p1500_p3, %p1881_p5 }
  0x2d   : > { %s2343_s16 = sshll.u32 %s1917_s19, 1  ;;  %s2344_s21 = sshll.u32 %s1786_s27, 5 }
  0x2e   : > { %s2371_s1 = sld [smem:[#allocation21_spill]]  ;;  %s1954_s29 = scalar_lea.sflag [#allocation6], %s287_s20 }
  0x2f   : > { %p1960_p11 = pneg %p1937_p4 }
  0x32   : > { %1480 = dma.hbm_to_vmem [thread:$0]  (!%p1910_p2), %s2369_s3, 512, %s233_s17, [#allocation9], %s2339_s22, %s2339_s22, %s2341_s23  }
  0x33   : > { %s291_s17 = scalar_lea.vmem [#allocation5], %s2343_s16 }
  0x34   : > { %s1948_s30 = scalar_lea.hbm %s2371_s1, %s2344_s21  ;;  %s298_s11 = sshll.u32 %s291_s17, 4  ;;  %s1952_s11 = int_to_ptr.vmem [resolvable:$true] %s298_s11 }
  0x35   : > { %s1604_s8 = scalar_lea.hbm %s1948_s30, 32  ;;  %s1609_s23 = scalar_lea.hbm %s2371_s1, 64 }
  0x36   : > { %p1605_p5 = scmp.ne.s32.totalorder %s1948_s30, %s1604_s8  ;;  %p1610_p8 = scmp.lt.s32.totalorder %s1948_s30, %s2371_s1 }
  0x37   : > { %p1611_p9 = scmp.lt.s32.totalorder %s1609_s23, %s1604_s8 }
  0x38   : > { %p1607_p12 = pnand %p1960_p11, %p1605_p5 }
  0x39   : > { %p1612_p10 = por %p1611_p9, %p1610_p8 }
  0x3a   : > { %p1608_p3 = pneg %p1607_p12 }
  0x3c   : > { %p1613_p1 = pnand %p1612_p10, %p1608_p3 }
  0x3e   : > { %1616 = shalt.err (!%p1613_p1)
}
  0x3f   : > { %s1617_s20 = scalar_lea.vmem %s1952_s11, 32  ;;  %s1791_s21 = smov [#allocation5]  }
  0x40   : > { %p1618_p0 = scmp.ne.s32.totalorder %s1952_s11, %s1617_s20  ;;  %s1622_s26 = sshll.u32 %s1791_s21, 4  ;;  %s1623_s26 = int_to_ptr.vmem [resolvable:$false] %s1622_s26 }
  0x41   : > { %s1624_s10 = scalar_lea.vmem %s1623_s26, 64  ;;  %p1625_p7 = scmp.lt.s32.totalorder %s1952_s11, %s1623_s26 }
  0x42   : > { %p1620_p5 = pnand %p1618_p0, %p1960_p11  ;;  %p1626_p6 = scmp.lt.s32.totalorder %s1624_s10, %s1617_s20 }
  0x44   : > { %p1621_p12 = pneg %p1620_p5  ;;  %p1627_p13 = por %p1626_p6, %p1625_p7 }
  0x46   : > { %p1628_p2 = pnand %p1627_p13, %p1621_p12 }
  0x48   : > { %1631 = shalt.err (!%p1628_p2)
}
  0x49   : > { %s2353_s23 = smov 16   ;;  %s2354_s16 = smov 1  }
  0x4a   : > { %1490 = dma.hbm_to_vmem [thread:$0]  (!%p1937_p4), %s1948_s30, 32, %s1952_s11, %s1954_s29, %s2353_s23, %s2353_s23, %s2354_s16  }
  0x4b   : > { %s2373_s21 = sshll.u32 %s1786_s27, 5  ;;  %s2374_s26 = sshll.u32 %s1917_s19, 1 }
  0x4c   : > { %s1991_s20 = scalar_lea.hbm %s2328_s2, %s2373_s21  ;;  %s312_s10 = scalar_lea.vmem [#allocation7], %s2374_s26 }
  0x4d   : > { %s319_s1 = sshll.u32 %s312_s10, 4  ;;  %s1794_s3 = smov [#allocation10]   ;;  %s2008_s1 = int_to_ptr.vmem [resolvable:$true] %s319_s1 }
  0x4e   : > { %s248_s14 = sshll.u32 %s1794_s3, 4  ;;  %s1458_s24 = smul.u32 48, %s1917_s19  ;;  %s249_s14 = int_to_ptr.vmem [resolvable:$true] %s248_s14 }
  0x4f   : > { %s1643_s7 = scalar_lea.vmem %s249_s14, 2048  ;;  %p2375_p13 = scmp.ne.s32.totalorder %s2368_s18, 0 }
  0x50   : > { %p1644_p6 = scmp.ne.s32.totalorder %s249_s14, %s1643_s7  ;;  %p1651_p3 = scmp.lt.s32.totalorder %s249_s14, %s249_s14 }
  0x51   : > { %p2376_p2 = pneg %p2375_p13  ;;  %p1652_p8 = scmp.lt.s32.totalorder %s1643_s7, %s1643_s7 }
  0x53   : > { %p1646_p0 = pnand %p1644_p6, %p2376_p2  ;;  %p1653_p9 = por %p1652_p8, %p1651_p3 }
  0x55   : > { %p1647_p7 = pneg %p1646_p0 }
  0x57   : > { %p1654_p10 = pnand %p1653_p9, %p1647_p7 }
  0x59   : > { %1657 = shalt.err (!%p1654_p10)
}
  0x5a   : > { %s2377_s30 = smov 8   ;;  %s2378_s11 = smov 128  }
  0x5b   : > { %1483 = dma.hbm_to_vmem [thread:$0]  (!%p2375_p13), %s2331_s5, 2048, %s249_s14, [#allocation9], %s2378_s11, %s2378_s11, %s2377_s30  }
  0x5c   : > { %s1459_s8 = smul.u32 768, %s1786_s27  ;;  %s269_s17 = scalar_lea.vmem [#allocation2], %s1458_s24 }
  0x5d   : > { %s277_s7 = sshll.u32 %s269_s17, 4  ;;  %s266_s18 = scalar_lea.sflag [#allocation3], %s1917_s19  ;;  %s2015_s7 = int_to_ptr.vmem [resolvable:$true] %s277_s7 }
  0x5e   : > { %s2013_s23 = scalar_lea.hbm %s2326_s0, %s1459_s8  ;;  %s1663_s24 = scalar_lea.hbm %s2326_s0, 1536 }
  0x5f   : > { %s1658_s21 = scalar_lea.hbm %s2013_s23, 768  ;;  %p1664_p6 = scmp.lt.s32.totalorder %s2013_s23, %s2326_s0 }
  0x60   : > { %p1659_p1 = scmp.ne.s32.totalorder %s2013_s23, %s1658_s21  ;;  %p1665_p13 = scmp.lt.s32.totalorder %s1663_s24, %s1658_s21 }
  0x62   : > { %p1661_p5 = pnand %p1659_p1, %p1960_p11  ;;  %p1666_p2 = por %p1665_p13, %p1664_p6 }
  0x64   : > { %p1662_p12 = pneg %p1661_p5 }
  0x66   : > { %p1667_p0 = pnand %p1666_p2, %p1662_p12 }
  0x68   : > { %1670 = shalt.err (!%p1667_p0)
}
  0x69   : > { %s1671_s19 = scalar_lea.vmem %s2015_s7, 768  ;;  %s1795_s8 = smov [#allocation2]  }
  0x6a   : > { %p1672_p7 = scmp.ne.s32.totalorder %s2015_s7, %s1671_s19  ;;  %s1676_s26 = sshll.u32 %s1795_s8, 4  ;;  %s1677_s26 = int_to_ptr.vmem [resolvable:$false] %s1676_s26 }
  0x6b   : > { %s1678_s10 = scalar_lea.vmem %s1677_s26, 1536  ;;  %p1679_p9 = scmp.lt.s32.totalorder %s2015_s7, %s1677_s26 }
  0x6c   : > { %p1674_p3 = pnand %p1672_p7, %p1960_p11  ;;  %p1680_p10 = scmp.lt.s32.totalorder %s1678_s10, %s1671_s19 }
  0x6e   : > { %p1675_p8 = pneg %p1674_p3  ;;  %p1681_p1 = por %p1680_p10, %p1679_p9 }
  0x70   : > { %p1682_p5 = pnand %p1681_p1, %p1675_p8 }
  0x72   : > { %1685 = shalt.err (!%p1682_p5)
}
  0x73   : > { %1487 = dma.hbm_to_vmem [thread:$0]  (!%p1937_p4), %s2013_s23, 768, %s2015_s7, %s266_s18, %s2378_s11, %s2378_s11, %s2377_s30  }
  0x74   : > { %s1686_s16 = scalar_lea.hbm %s1991_s20, 32  ;;  %s1691_s3 = scalar_lea.hbm %s2328_s2, 64 }
  0x75   : > { %p1687_p12 = scmp.ne.s32.totalorder %s1991_s20, %s1686_s16  ;;  %p1692_p2 = scmp.lt.s32.totalorder %s1991_s20, %s2328_s2 }
  0x76   : > { %p1693_p0 = scmp.lt.s32.totalorder %s1691_s3, %s1686_s16 }
  0x77   : > { %p1689_p6 = pnand %p1687_p12, %p1960_p11 }
  0x78   : > { %p1694_p7 = por %p1693_p0, %p1692_p2 }
  0x79   : > { %p1690_p13 = pneg %p1689_p6 }
  0x7b   : > { %p1695_p3 = pnand %p1694_p7, %p1690_p13 }
  0x7d   : > { %1698 = shalt.err (!%p1695_p3)
}
  0x7e   : > { %s1699_s23 = scalar_lea.vmem %s2008_s1, 32  ;;  %s1796_s30 = smov [#allocation7]  }
  0x7f   : > { %p1700_p8 = scmp.ne.s32.totalorder %s2008_s1, %s1699_s23  ;;  %s1704_s11 = sshll.u32 %s1796_s30, 4  ;;  %s1705_s11 = int_to_ptr.vmem [resolvable:$false] %s1704_s11 }
  0x80   : > { %s1706_s7 = scalar_lea.vmem %s1705_s11, 64  ;;  %p1707_p1 = scmp.lt.s32.totalorder %s2008_s1, %s1705_s11 }
  0x81   : > { %p1702_p9 = pnand %p1700_p8, %p1960_p11  ;;  %p1708_p5 = scmp.lt.s32.totalorder %s1706_s7, %s1699_s23 }
  0x83   : > { %p1703_p10 = pneg %p1702_p9  ;;  %p1709_p12 = por %p1708_p5, %p1707_p1 }
  0x85   : > { %p1710_p6 = pnand %p1709_p12, %p1703_p10 }
  0x87   : > { %1713 = shalt.err (!%p1710_p6)
}
  0x88   : > { %s2379_s18 = smov 1   ;;  %s2380_s19 = smov 16  }
  0x89   : > { %1493 = dma.hbm_to_vmem [thread:$0]  (!%p1937_p4), %s1991_s20, 32, %s2008_s1, %s1954_s29, %s2380_s19, %s2380_s19, %s2379_s18  }
  0x8a   : > { %p2381_p11 = scmp.ne.s32.totalorder %s2367_s15, 0 }
  0x8b   : > { %s2068_s22 = sand.u32 (!%p2381_p11), 1, %s1778_s25   ;;  %p2382_p13 = scmp.ne.s32.totalorder (!%p2381_p11), %s2363_s12, 0 }
  0x8c   : > { %331 = sbr.rel (%p2381_p11) target bundleno = 1660 (0x67c), region = 48  ;;  %s334_s26 = scalar_lea.sflag (!%p2381_p11), [#allocation3], %s2068_s22 }
  0x8d   : > { %s1460_s8 = smul.u32 (!%p2381_p11), 48, %s2068_s22 }
  0x8f   : > { %s2072_s10 = scalar_lea.vmem (!%p2381_p11), [#allocation2], %s1460_s8 }
  0x91   : > { %1757 = dma.done.wait (%p2382_p13), %s334_s26, 768  }
  0x92   : > { %1759 = vsyncadd (%p2382_p13), %s334_s26, 4294966528  ;;  %s342_s1 = sand.u32 1, %s1863_s28   ;;  %s1242_s15 = sshll.u32 %s2068_s22, 1 }
  0x93   : > { %s343_s9 = scalar_lea.sflag [#allocation6], %s342_s1  ;;  %s2080_s29 = scalar_lea.vmem [#allocation5], %s1242_s15 }
  0x94   : > { %1761 = dma.done.wait (%p2382_p13), %s343_s9, 64  }
  0x95   : > { %1763 = vsyncadd (%p2382_p13), %s343_s9, 4294967232  ;;  %s2086_s20 = scalar_lea.vmem [#allocation7], %s1242_s15  ;;  %p2383_p4 = scmp.eq.s32.totalorder %s1863_s28, 0 }
  0x97   : > { %1765 = dma.done.wait (%p2383_p4), [#allocation9], 2560   ;;  %p2384_p2 = pmov %p2383_p4 }
  0x98   : > { %v1797_v0 = vmov 0.0   ;;  %vm1798_vm0 = vmmov 0   ;;  %v2095_v1 = vld [vmem:[#allocation10 + $0x78] sm:$0xff]  ;;  %v2097_v2 = vld [vmem:[#allocation10 + $0x70] sm:$0xff]  ;;  %v2101_v3 = vld [vmem:[#allocation10 + $0x68] sm:$0xff]  ;;  %vm442_vm1 = vcmask 261120   ;;  %v627_v29 = vlaneseq }
  0x99   : > { %1767 = vsyncadd (%p2384_p2), [#allocation9], 4294964736  ;;  %1352 = vmatprep.subr.mxu1 %v1797_v0  ;;  %1384 = vmatprep.mubr.msk.f32.mxu1 %vm1798_vm0, %v1797_v0  ;;  %v434_v4 = vld [vmem:[#allocation8 + $0x18] sm:$0xff]  ;;  %v433_v5 = vld [vmem:[#allocation8 + $0x10] sm:$0xff]  ;;  %vm729_vm2 = vcmask 191488   ;;  %vm741_vm3 = vcmask 195584  }
  0x9a   : > { %1353 = vmatpush3.msra.mxu1 %v2095_v1  ;;  %1335 = vmatprep.subr.mxu0 %v434_v4  ;;  %v2105_v6 = vld [vmem:[#allocation10 + $0x60] sm:$0xff]  ;;  %v432_v7 = vld [vmem:[#allocation8 + $0x8] sm:$0xff]  ;;  %v2109_v8 = vld [vmem:[#allocation10 + $0x58] sm:$0xff]  ;;  %v2189_v31 = vshrl.u32 %v627_v29, 7  ;;  %s1246_s3 = sshll.u32 %s2068_s22, 3  ;;  %vm815_vm4 = vcmask 257024  }
  0x9b   : > { %1354 = vmatprep.subr.mxu1 %v1797_v0  ;;  %1336 = vmatpush3.msra.mxu0 %v434_v4  ;;  %v431_v9 = vld [vmem:[#allocation8] sm:$0xff]  ;;  %v2113_v10 = vld [vmem:[#allocation10 + $0x50] sm:$0xff]  ;;  %v408_v11 = vld [vmem:[%s2072_s10] sm:$0xff]  ;;  %s403_s24 = scalar_lea.vmem [#allocation11], %s1246_s3  ;;  %s1274_s23 = sshll.u32 %s1863_s28, 7 }
  0x9c   : > { %1355 = vmatpush3.msra.mxu1 %v2097_v2  ;;  %1337 = vmatprep.subr.mxu0 %v433_v5  ;;  %v409_v12 = vld [vmem:[%s2072_s10 + $0x8] sm:$0xff]  ;;  %v2119_v13 = vld [vmem:[#allocation10 + $0x48] sm:$0xff]  ;;  %v2131_v16 = vld [vmem:[%s2072_s10 + $0x18] sm:$0xff]  ;;  %v629_v33 = vsub.s32 0, %v2189_v31  ;;  %s1092_s17 = sshll.u32 %s403_s24, 4  ;;  %s2385_s7 = sld [smem:[#allocation23_spill]]  ;;  %s2277_s17 = int_to_ptr.vmem [resolvable:$true] %s1092_s17 }
  0x9d   : > { %1356 = vmatprep.subr.mxu1 %v1797_v0  ;;  %1338 = vmatpush3.msra.mxu0 %v433_v5  ;;  %v410_v14 = vld [vmem:[%s2072_s10 + $0x10] sm:$0xff]  ;;  %v2125_v15 = vld [vmem:[#allocation10 + $0x40] sm:$0xff]  ;;  %v2139_v18 = vld [vmem:[#allocation10 + $0x30] sm:$0xff]  ;;  %s1079_s19 = scalar_lea.sflag [#allocation4], %s2068_s22  ;;  %s1714_s8 = scalar_lea.vmem %s2277_s17, 128 }
  0x9e   : > { %1357 = vmatpush3.msra.mxu1 %v2101_v3  ;;  %1339 = vmatprep.subr.mxu0 %v432_v7  ;;  %v2134_v17 = vld [vmem:[#allocation10 + $0x38] sm:$0xff]  ;;  %v2145_v19 = vld [vmem:[#allocation10 + $0x28] sm:$0xff]  ;;  %v2149_v20 = vld [vmem:[#allocation10 + $0x20] sm:$0xff]  ;;  %p1715_p0 = scmp.ne.s32.totalorder %s2277_s17, %s1714_s8  ;;  %p2386_p7 = scmp.ne.s32.totalorder %s2364_s13, 0 }
  0x9f   : > { %1358 = vmatprep.subr.mxu1 %v1797_v0  ;;  %1340 = vmatpush3.msra.mxu0 %v432_v7  ;;  %v2153_v21 = vld [vmem:[#allocation10 + $0x18] sm:$0xff]  ;;  %v2157_v22 = vld [vmem:[#allocation10 + $0x10] sm:$0xff]  ;;  %v2161_v23 = vld [vmem:[#allocation10 + $0x8] sm:$0xff]  ;;  %s1799_s28 = smov [#allocation11]  }
  0xa0   : > { %1359 = vmatpush3.msra.mxu1 %v2105_v6  ;;  %1341 = vmatprep.subr.mxu0 %v431_v9  ;;  %v2165_v24 = vld [vmem:[#allocation10] sm:$0xff]  ;;  %v556_v25 = vld [vmem:[%s2086_s20] sm:$0x1]  ;;  %v2197_v34 = vld [vmem:[%s2330_s4] ss:$0 sm:$0xff]  ;;  %p1716_p3 = pnand %p1715_p0, %p2386_p7  ;;  %s1718_s26 = sshll.u32 %s1799_s28, 4  ;;  %s1719_s26 = int_to_ptr.vmem [resolvable:$false] %s1718_s26 }
  0xa1   : > { %1360 = vmatprep.subr.mxu1 %v1797_v0  ;;  %1342 = vmatpush3.msra.mxu0 %v431_v9  ;;  %v2178_v26 = vld [vmem:[%s2072_s10 + $0x20] sm:$0xff]  ;;  %v2183_v27 = vld [vmem:[%s2072_s10 + $0x28] sm:$0xff]  ;;  %s1720_s10 = scalar_lea.vmem %s1719_s26, 256  ;;  %p1721_p9 = scmp.lt.s32.totalorder %s2277_s17, %s1719_s26 }
  0xa2   : > { %1361 = vmatpush3.msra.mxu1 %v2109_v8  ;;  %1343 = vmatprep.mubr.msk.f32.mxu0 %vm442_vm1, %v408_v11  ;;  %v2209_v57 = vld [vmem:[%s2332_s6] sm:$0xf]  ;;  %v1259_v58 = vld [vmem:[%s2086_s20 + $0x1] sm:$0x1]  ;;  %s2282_s18 = scalar_lea.hbm %s2385_s7, %s1274_s23  ;;  %p1717_p8 = pneg %p1716_p3 }
  0xa3   : > { %1362 = vmatprep.subr.mxu1 %v1797_v0  ;;  %1344 = vmatmul.mubr.msk.f32.vlgmr.msra.gmra.mxu0 %vm442_vm1, %v409_v12  ;;  %v1257_v61 = vld [vmem:[%s2080_s29] ss:$0 sm:$0xff]  ;;  %p1722_p10 = scmp.lt.s32.totalorder %s1720_s10, %s1714_s8 }
  0xa4   : > { %1363 = vmatpush3.msra.mxu1 %v2113_v10  ;;  %1346 = vmatprep.mubr.msk.f32.mxu0 %vm442_vm1, %v410_v14 }
  0xa5   : > { %1364 = vmatprep.subr.mxu1 %v1797_v0  ;;  %1387 = vmatprep.subr.mxu0 %v1797_v0  ;;  %p1723_p1 = por %p1722_p10, %p1721_p9 }
  0xa6   : > { %1365 = vmatpush3.msra.mxu1 %v2119_v13 }
  0xa7   : > { %1366 = vmatprep.subr.mxu1 %v1797_v0  ;;  %1347 = vmatmul.mubr.msk.f32.gmra.mxu0 %vm442_vm1, %v2131_v16  ;;  %p1724_p5 = pnand %p1723_p1, %p1717_p8 }
  0xa8   : > { %1367 = vmatpush3.msra.mxu1 %v2125_v15  ;;  %1349 = vmatprep.mubr.msk.f32.mxu0 %vm442_vm1, %v2178_v26 }
  0xa9   : > { %1368 = vmatprep.subr.mxu1 %v1797_v0 }
  0xaa   : > { %1369 = vmatpush3.msra.mxu1 %v2134_v17 }
  0xab   : > { %1370 = vmatprep.subr.mxu1 %v1797_v0  ;;  %1350 = vmatmul.mubr.msk.f32.gmra.mxu0 %vm442_vm1, %v2183_v27 }
  0xac   : > { %1371 = vmatpush3.msra.mxu1 %v2139_v18  ;;  %1393 = vmatprep.mubr.msk.f32.mxu0 %vm1798_vm0, %v1797_v0 }
  0xad   : > { %1372 = vmatprep.subr.mxu1 %v1797_v0 }
  0xae   : > { %1373 = vmatpush3.msra.mxu1 %v2145_v19 }
  0xaf   : > { %1374 = vmatprep.subr.mxu1 %v1797_v0 }
  0xb0   : > { %1375 = vmatpush3.msra.mxu1 %v2149_v20 }
  0xb1   : > { %1376 = vmatprep.subr.mxu1 %v1797_v0 }
  0xb2   : > { %1377 = vmatpush3.msra.mxu1 %v2153_v21 }
  0xb3   : > { %1378 = vmatprep.subr.mxu1 %v1797_v0 }
  0xb4   : > { %1379 = vmatpush3.msra.mxu1 %v2157_v22 }
  0xb5   : > { %1380 = vmatprep.subr.mxu1 %v1797_v0 }
  0xb6   : > { %1381 = vmatpush3.msra.mxu1 %v2161_v23 }
  0xb7   : > { %1382 = vmatprep.subr.mxu1 %v1797_v0 }
  0xb8   : > { %1383 = vmatpush3.msra.mxu1 %v2165_v24 }
  0xb9   : > { %1385 = vmatmul.mubr.f32.vlgmr.msra.gmra.mxu1 %v556_v25  ;;  %1396 = vmatprep.subr.mxu1 %v1797_v0 }
  0xba   : > { %1397 = vmatpush3.msra.mxu1 %v410_v14  ;;  %1402 = vmatprep.mubr.msk.f32.mxu1 %vm1798_vm0, %v1797_v0 }
  0xbb   : > { %1398 = vmatprep.subr.mxu1 %v1797_v0 }
  0xbc   : > { %1399 = vmatpush3.msra.mxu1 %v409_v12 }
  0xbd   : > { %1400 = vmatprep.subr.mxu1 %v1797_v0 }
  0xbe   : > { %1401 = vmatpush3.msra.mxu1 %v408_v11 }
  0xbf   : > { %1440 = vmatprep.subr.mxu1 %v1797_v0 }
 0x163   : > { %v1345_v28 = vpop.f32.mrf.mxu0 }
 0x164   : > { %v533_v37 = vadd.f32 %v1345_v28, %v2197_v34 }
 0x165   : > { %v527_v30 = vpop.f32.mrf.mxu0 }
 0x166   : > { %v528_v41 = vadd.f32 %v2197_v34, %v527_v30 }
 0x167   : > { %v2191_v32 = vpop.f32.mrf.mxu0 }
 0x168   : > { %v543_v4 = vadd.f32 %v2191_v32, %v2197_v34 }
 0x169   : > { %v537_v35 = vpop.f32.mrf.mxu0 }
 0x16a   : > { %v538_v38 = vadd.f32 %v2197_v34, %v537_v35 }
 0x16b   : > { %v1351_v59 = vpop.f32.mrf.mxu0 }
 0x16c   : > { %v553_v5 = vadd.f32 %v1351_v59, %v2197_v34 }
 0x16d   : > { %v547_v60 = vpop.f32.mrf.mxu0 }
 0x179   : > { %v623_v36 = vpop.f32.mrf.mxu1 }
 0x17a   : > { %v630_v39 = vrot.slane %v623_v36, %v629_v33 }
 0x17b   : > { %v1386_v40 = vpop.f32.mrf.mxu1 }
 0x17c   : > { %v632_v42 = vadd.f32 %v630_v39, %v533_v37  ;;  %v633_v43 = vadd.f32 %v630_v39, %v538_v38  ;;  %v631_v44 = vadd.f32 %v630_v39, %v528_v41  ;;  %v1264_v37 = vld [vmem:[%s2080_s29 + $0x1] ss:$0 sm:$0xff] }
 0x17e   : > { %v1255_v45 = vmul.f32 -1.442695, %v632_v42  ;;  %v1256_v46 = vmul.f32 -1.442695, %v633_v43  ;;  %v1254_v47 = vmul.f32 -1.442695, %v631_v44 }
 0x180   : > { %1546 = vpow2.f32 %v1255_v45 }
 0x181   : > { %1548 = vpow2.f32 %v1256_v46 }
 0x182   : > { %1550 = vpow2.f32 %v1254_v47 }
 0x18d   : > { %v1547_v48 = vpop.eup %1546 }
 0x18e   : > { %v1549_v49 = vpop.eup %1548  ;;  %v644_v51 = vadd.f32 1.0, %v1547_v48 }
 0x18f   : > { %v645_v50 = vadd.f32 1.0, %v1549_v49  ;;  %v1551_v52 = vpop.eup %1550 }
 0x190   : > { %v643_v53 = vadd.f32 1.0, %v1551_v52 }
 0x191   : > { %1552 = vrcp.f32 %v645_v50 }
 0x192   : > { %1554 = vrcp.f32 %v644_v51 }
 0x193   : > { %1556 = vrcp.f32 %v643_v53 }
 0x19e   : > { %v1553_v54 = vpop.eup %1552 }
 0x19f   : > { %1388 = vmatpush3.xpose.msra.mxu0 %v1553_v54  ;;  %v1555_v55 = vpop.eup %1554 }
 0x1a0   : > { %1389 = vmatprep.subr.mxu0 %v1797_v0  ;;  %v1557_v56 = vpop.eup %1556 }
 0x1a3   : > { %1390 = vmatpush3.xpose.msra.mxu0 %v1555_v55 }
 0x1a4   : > { %1391 = vmatprep.subr.mxu0 %v1797_v0 }
 0x1a7   : > { %1392 = vmatpush3.xpose.msra.mxu0 %v1557_v56 }
 0x1a8   : > { %1405 = vmatprep.subr.mxu0 %v1797_v0 }
 0x1aa   : > { %1394 = vmatmul.mubr.f32.vlgmr.msra.gmra.mxu0 %v2209_v57 }
 0x1ab   : > { %1406 = vmatpush3.msra.mxu0 %v2095_v1  ;;  %1437 = vmatprep.mubr.msk.f32.mxu0 %vm1798_vm0, %v1797_v0 }
 0x1ac   : > { %1407 = vmatprep.subr.mxu0 %v1797_v0 }
 0x1ad   : > { %1408 = vmatpush3.msra.mxu0 %v2097_v2 }
 0x1ae   : > { %1409 = vmatprep.subr.mxu0 %v1797_v0 }
 0x1af   : > { %1410 = vmatpush3.msra.mxu0 %v2101_v3 }
 0x1b0   : > { %1411 = vmatprep.subr.mxu0 %v1797_v0 }
 0x1b1   : > { %1412 = vmatpush3.msra.mxu0 %v2105_v6 }
 0x1b2   : > { %1413 = vmatprep.subr.mxu0 %v1797_v0 }
 0x1b3   : > { %1414 = vmatpush3.msra.mxu0 %v2109_v8 }
 0x1b4   : > { %1415 = vmatprep.subr.mxu0 %v1797_v0 }
 0x1b5   : > { %1416 = vmatpush3.msra.mxu0 %v2113_v10 }
 0x1b6   : > { %1417 = vmatprep.subr.mxu0 %v1797_v0 }
 0x1b7   : > { %1418 = vmatpush3.msra.mxu0 %v2119_v13 }
 0x1b8   : > { %1419 = vmatprep.subr.mxu0 %v1797_v0 }
 0x1b9   : > { %1420 = vmatpush3.msra.mxu0 %v2125_v15  ;;  %v548_v15 = vadd.f32 %v2197_v34, %v547_v60 }
 0x1ba   : > { %1421 = vmatprep.subr.mxu0 %v1797_v0 }
 0x1bb   : > { %1422 = vmatpush3.msra.mxu0 %v2134_v17 }
 0x1bc   : > { %1423 = vmatprep.subr.mxu0 %v1797_v0 }
 0x1bd   : > { %1424 = vmatpush3.msra.mxu0 %v2139_v18 }
 0x1be   : > { %1425 = vmatprep.subr.mxu0 %v1797_v0 }
 0x1bf   : > { %1426 = vmatpush3.msra.mxu0 %v2145_v19 }
 0x1c0   : > { %1427 = vmatprep.subr.mxu0 %v1797_v0 }
 0x1c1   : > { %1428 = vmatpush3.msra.mxu0 %v2149_v20 }
 0x1c2   : > { %1429 = vmatprep.subr.mxu0 %v1797_v0 }
 0x1c3   : > { %1430 = vmatpush3.msra.mxu0 %v2153_v21 }
 0x1c4   : > { %1431 = vmatprep.subr.mxu0 %v1797_v0 }
 0x1c5   : > { %1432 = vmatpush3.msra.mxu0 %v2157_v22 }
 0x1c6   : > { %1433 = vmatprep.subr.mxu0 %v1797_v0 }
 0x1c7   : > { %1434 = vmatpush3.msra.mxu0 %v2161_v23 }
 0x1c8   : > { %1435 = vmatprep.subr.mxu0 %v1797_v0 }
 0x1c9   : > { %1436 = vmatpush3.msra.mxu0 %v2165_v24 }
 0x1ca   : > { %1438 = vmatmul.mubr.f32.vlgmr.msra.gmra.mxu0 %v1259_v58 }
 0x26a   : > { %v725_v62 = vpop.f32.mrf.mxu0 }
 0x26b   : > { %v726_v63 = vadd.f32 %v1257_v61, %v725_v62 }
 0x26c   : > { %v1395_v1 = vpop.f32.mrf.mxu0 }
 0x26d   : > { %v730_v2 = vsel %vm729_vm2, %v726_v63, -inf }
 0x26e   : > { %731 = vmax.xlane.f32.xlu0 %v730_v2 }
 0x28a   : > { %v885_v3 = vpop.f32.mrf.mxu0 }
 0x28b   : > { %v892_v6 = vrot.slane %v885_v3, %v629_v33 }
 0x28c   : > { %v1439_v7 = vpop.f32.mrf.mxu0 }
 0x28d   : > { %v893_v8 = vadd.f32 %v892_v6, %v543_v4  ;;  %v895_v9 = vadd.f32 %v892_v6, %v553_v5  ;;  %v894_v17 = vadd.f32 %v892_v6, %v548_v15 }
 0x28f   : > { %v1262_v18 = vmul.f32 -1.442695, %v895_v9  ;;  %v1261_v19 = vmul.f32 -1.442695, %v894_v17  ;;  %v1260_v20 = vmul.f32 -1.442695, %v893_v8 }
 0x2f7   : > { %v732_v10 = vpop.xlane.xlu0 %731 }
 0x2f8   : > { %v733_v11 = vsub.f32 %v726_v63, %v732_v10 }
 0x2fa   : > { %v734_v12 = vmul.f32 1.442695, %v733_v11 }
 0x2fc   : > { %1558 = vpow2.f32 %v734_v12 }
 0x2fd   : > { %1560 = vpow2.f32 %v1262_v18 }
 0x2fe   : > { %1562 = vpow2.f32 %v1261_v19 }
 0x2ff   : > { %1564 = vpow2.f32 %v1260_v20 }
 0x309   : > { %v1559_v13 = vpop.eup %1558 }
 0x30a   : > { %v736_v14 = vsel %vm729_vm2, %v1559_v13, 0.0  ;;  %v1561_v21 = vpop.eup %1560 }
 0x30b   : > { %737 = vadd.xlane.f32.xlu0 %v736_v14  ;;  %v907_v22 = vadd.f32 1.0, %v1561_v21  ;;  %v1563_v24 = vpop.eup %1562 }
 0x30c   : > { %v906_v25 = vadd.f32 1.0, %v1563_v24  ;;  %v1565_v28 = vpop.eup %1564 }
 0x30d   : > { %v905_v29 = vadd.f32 1.0, %v1565_v28 }
 0x394   : > { %v738_v23 = vpop.xlane.xlu0 %737 }
 0x395   : > { %1566 = vrcp.f32 %v738_v23 }
 0x396   : > { %1568 = vrcp.f32 %v907_v22 }
 0x397   : > { %1570 = vrcp.f32 %v906_v25 }
 0x398   : > { %1572 = vrcp.f32 %v905_v29 }
 0x3a2   : > { %v1567_v30 = vpop.eup %1566 }
 0x3a3   : > { %v740_v31 = vmul.f32 %v1567_v30, %v1559_v13  ;;  %v1569_v32 = vpop.eup %1568 }
 0x3a4   : > { %v1571_v33 = vpop.eup %1570 }
 0x3a5   : > { %1403 = vmatmul.mubr.msk.f32.vlgmr.msra.gmra.mxu1 %vm741_vm3, %v740_v31  ;;  %v1573_v34 = vpop.eup %1572 }
 0x3a6   : > { %1441 = vmatpush3.xpose.msra.mxu1 %v1569_v32  ;;  %1446 = vmatprep.mubr.msk.f32.mxu1 %vm1798_vm0, %v1797_v0 }
 0x3a7   : > { %1442 = vmatprep.subr.mxu1 %v1797_v0 }
 0x3aa   : > { %1443 = vmatpush3.xpose.msra.mxu1 %v1571_v33 }
 0x3ab   : > { %1444 = vmatprep.subr.mxu1 %v1797_v0 }
 0x3ae   : > { %1445 = vmatpush3.xpose.msra.mxu1 %v1573_v34 }
 0x3af   : > { %1449 = vmatprep.subr.mxu1 %v1797_v0 }
 0x3b1   : > { %1447 = vmatmul.mubr.f32.vlgmr.msra.gmra.mxu1 %v2209_v57 }
 0x3b2   : > { %1450 = vmatpush3.msra.mxu1 %v2183_v27  ;;  %1455 = vmatprep.mubr.msk.f32.mxu1 %vm1798_vm0, %v1797_v0 }
 0x3b3   : > { %1451 = vmatprep.subr.mxu1 %v1797_v0 }
 0x3b4   : > { %1452 = vmatpush3.msra.mxu1 %v2178_v26 }
 0x3b5   : > { %1453 = vmatprep.subr.mxu1 %v1797_v0 }
 0x3b6   : > { %1454 = vmatpush3.msra.mxu1 %v2131_v16 }
 0x465   : > { %v811_v35 = vpop.f32.mrf.mxu1 }
 0x466   : > { %816 = vst.msk [vmem:[%s403_s24] sm:$0xf] %vm815_vm4, %v811_v35 }
 0x467   : > { %v1404_v36 = vpop.f32.mrf.mxu1 }
 0x471   : > { %v988_v27 = vpop.f32.mrf.mxu1 }
 0x472   : > { %v989_v38 = vadd.f32 %v1264_v37, %v988_v27 }
 0x473   : > { %v1448_v39 = vpop.f32.mrf.mxu1 }
 0x474   : > { %v992_v40 = vsel %vm729_vm2, %v989_v38, -inf }
 0x475   : > { %993 = vmax.xlane.f32.xlu1 %v992_v40 }
 0x4fe   : > { %v994_v26 = vpop.xlane.xlu1 %993 }
 0x4ff   : > { %v995_v41 = vsub.f32 %v989_v38, %v994_v26 }
 0x501   : > { %v996_v0 = vmul.f32 1.442695, %v995_v41 }
 0x503   : > { %1574 = vpow2.f32 %v996_v0 }
 0x510   : > { %v1575_v16 = vpop.eup %1574 }
 0x511   : > { %v998_v42 = vsel %vm729_vm2, %v1575_v16, 0.0 }
 0x512   : > { %999 = vadd.xlane.f32.xlu1 %v998_v42 }
 0x59b   : > { %v1000_v43 = vpop.xlane.xlu1 %999 }
 0x59c   : > { %1576 = vrcp.f32 %v1000_v43 }
 0x5a9   : > { %v1577_v44 = vpop.eup %1576 }
 0x5aa   : > { %v1002_v45 = vmul.f32 %v1577_v44, %v1575_v16 }
 0x5ac   : > { %1456 = vmatmul.mubr.msk.f32.vlgmr.msra.gmra.mxu1 %vm741_vm3, %v1002_v45 }
 0x66c   : > { %v1072_v46 = vpop.f32.mrf.mxu1 }
 0x66d   : > { %1266 = vst.msk [vmem:[%s403_s24 + $0x4] sm:$0xf] %vm815_vm4, %v1072_v46 }
 0x66e   : > { %v1457_v47 = vpop.f32.mrf.mxu1 }
 0x66f   : > { %1727 = shalt.err (!%p1724_p5)
}
 0x670   : > { %s1728_s1 = scalar_lea.hbm %s2282_s18, 128  ;;  %s1732_s29 = scalar_lea.hbm %s2385_s7, 256 }
 0x671   : > { %p1729_p12 = scmp.ne.s32.totalorder %s2282_s18, %s1728_s1  ;;  %p1733_p13 = scmp.lt.s32.totalorder %s2282_s18, %s2385_s7 }
 0x672   : > { %p1734_p4 = scmp.lt.s32.totalorder %s1732_s29, %s1728_s1 }
 0x673   : > { %p1730_p6 = pnand %p1729_p12, %p2386_p7 }
 0x674   : > { %p1735_p2 = por %p1734_p4, %p1733_p13 }
 0x675   : > { %p1731_p11 = pneg %p1730_p6 }
 0x677   : > { %p1736_p0 = pnand %p1735_p2, %p1731_p11 }
 0x679   : > { %1739 = shalt.err (!%p1736_p0)
}
 0x67a   : > { %s1800_s16 = smov 64   ;;  %s1801_s21 = smov 4  }
 0x67b   : > { %1475 = dma.vmem_to_hbm [thread:$0]  (%p2386_p7), %s2277_s17, 128, %s2282_s18, %s1079_s19, %s1800_s16, %s1800_s16, %s1801_s21  }
 0x67c PF: > { %s2387_s14 = sld [smem:[#allocation16_spill]]  ;;  %p2390_p8 = scmp.ge.s32.totalorder %s1786_s27, 2 }
 0x67d   : > { %s2388_s3 = sld [smem:[#allocation20_spill]] }
 0x682   : > { %s1107_s24 = sand.u32 1, %s2387_s14  }
 0x683   : > { %p2389_p3 = scmp.ne.s32.totalorder %s2388_s3, 0  ;;  %s1108_s23 = scalar_lea.sflag [#allocation4], %s1107_s24 }
 0x685   : > { %p1495_p9 = pnand %p2390_p8, %p2389_p3 }
 0x687   : > { %p1496_p10 = pneg %p1495_p9 }
 0x689   : > { %1769 = dma.done.wait (%p1496_p10), %s1108_s23, 128  }
 0x68a   : > { %1771 = vsyncadd (%p1496_p10), %s1108_s23, 4294967168  ;;  %s2391_s27 = sld [smem:[#allocation18_spill]]  ;;  %s2394_s24 = smov %s1778_s25 }
 0x68b   : > { %s2392_s30 = sld [smem:[#allocation17_spill]] }
 0x68c   : > { %s2393_s26 = sld [smem:[#allocation19_spill]] }
 0x690   : > { %p24_p1 = scmp.ge.s32.totalorder %s2391_s27, 4  }
 0x691   : > { %s2395_s25 = smov %s2392_s30 }
 0x692   :  { %26 = sbr.rel (!%p24_p1) target bundleno = 12 (0xc), region = 128 }
 0x697   :  { %1113 = vsyncpa [#allocation3], 1 }
 0x698   :  { %1115 = vsyncpa [#allocation3 + $0x1], 1 }
 0x699   :  { %1116 = vsyncpa [#allocation6], 1 }
 0x69a   :  { %1118 = vsyncpa [#allocation6 + $0x1], 1 }
 0x69b   :  { %1119 = vsyncpa [#allocation9], 1 }
 0x69c   :  { %1120 = vsyncpa [#allocation4], 1 }
 0x69d   :  { %1122 = vsyncpa [#allocation4 + $0x1], 1 }

</bundles_post_ra>
